<compile_context>
chip_gen: v5e
topology: v5e:2x2
jax: 0.10.0
libtpu: 0.0.40
codegen_flags: <defaults>
</compile_context>

<pallas_src>
import jax
import jax.numpy as jnp
from jax.experimental import pallas as pl
from jax.experimental.pallas import tpu as pltpu

NEG_SLOPE = 0.01    # nn.LeakyReLU default negative_slope
LANE = 128          # vreg lane width
SUBLANE = 8         # vreg sublane count


def _round_up(n, m):
    return (n + m - 1) // m * m


def _tpu_params():
    """Per-generation tuning: (mxu_quantum, two_tensorcores, vmem_limit_bytes)."""
    vmem_bytes = 128 * 1024 * 1024
    kind = ""
    try:
        info = pltpu.get_tpu_info()
        vmem_bytes = int(getattr(info, "vmem_capacity_bytes", vmem_bytes))
    except Exception:
        pass
    try:
        kind = jax.devices()[0].device_kind.lower()
    except Exception:
        pass
    is_v5 = "v5" in kind
    is_v7 = ("v7" in kind) or vmem_bytes <= 64 * 1024 * 1024
    mxu_quantum = 128 if is_v5 else 256          # MXU height: 4x128^2 (v5e) vs 2x256^2
    two_cores = is_v7                            # v7x: 2 TensorCores share the grid
    # Leave compiler headroom: ~80% of physical VMEM -> ~102 MiB (v5e/v6e), ~51 MiB (v7x).
    vmem_limit = min(int(vmem_bytes * 0.8), 112 * 1024 * 1024)
    return mxu_quantum, two_cores, vmem_limit


def _pick_tile_m(B, requested, quantum, two_cores):
    """Batch tile: multiple of 8, MXU-quantized, low padding waste, >=2 steps on v7x."""
    B8 = _round_up(B, SUBLANE)
    tile = _round_up(max(min(requested, B8), SUBLANE), SUBLANE)
    if tile >= B8:
        if two_cores and B8 >= 2 * quantum:
            # Split across both v7x TensorCores (>= 2 grid steps), minimal row padding.
            tile = _round_up((B8 + 1) // 2, SUBLANE)
        else:
            tile = B8                              # single tile, no extra padding
    else:
        if tile >= quantum:
            tile = (tile // quantum) * quantum     # match MXU pass height
        # Shrink tile toward 128/8 while last-tile zero padding exceeds ~12% of the work.
        while tile > 2 * SUBLANE:
            Bp = _round_up(B8, tile)
            if (Bp - B8) * 8 <= Bp:
                break
            tile = max(_round_up(tile // 2, SUBLANE), SUBLANE)
    return tile


# ----------------------------- fused Pallas kernel -------------------------- #

def _build_fused_mlp_kernel(num_hidden, use_norm, compute_dtype):
    """Kernel signature: (x_ref, [W_i, b_i] * num_hidden, head_W, [head_b], o_ref)."""

    def kernel(*refs):
        x_ref, o_ref = refs[0], refs[-1]
        h = x_ref[...].astype(jnp.float32)
        idx = 1
        for _ in range(num_hidden):
            w = refs[idx][...]                       # (in_p, out_p), storage dtype
            b = refs[idx + 1][...]                   # (1, out_p), f32
            idx += 2
            # bf16 (or f32) inputs to the MXU, f32 accumulation; bias add in f32.
            y = jnp.dot(h.astype(compute_dtype), w.astype(compute_dtype),
                        preferred_element_type=jnp.float32) + b
            h = jnp.maximum(y, NEG_SLOPE * y)        # LeakyReLU: single VPU max, f32
        wh = refs[idx][...]
        if use_norm:
            # Columns of wh were pre-normalized at init; only row-normalize h here.
            inv = jax.lax.rsqrt(
                jnp.maximum(jnp.sum(h * h, axis=1, keepdims=True), 1e-24))
            o = jnp.dot((h * inv).astype(compute_dtype), wh.astype(compute_dtype),
                        preferred_element_type=jnp.float32)
        else:
            bh = refs[idx + 1][...]
            o = jnp.dot(h.astype(compute_dtype), wh.astype(compute_dtype),
                        preferred_element_type=jnp.float32) + bh
        o_ref[...] = o.astype(o_ref.dtype)

    return kernel


# ------------------------------ MLP wrapper --------------------------------- #

class MLPPallas:
    def __init__(self, dim_in, dim_mlp_list, dim_out, use_norm=False, dropout=0.1,
                 weight_dtype=jnp.bfloat16, key=jax.random.PRNGKey(0)):
        del dropout  # eval-mode: identity
        self.use_norm = use_norm
        self.dim_in = dim_in
        self.dim_out = dim_out
        self.dim_mlp_list = list(dim_mlp_list)
        self.weight_dtype = weight_dtype
        self._hw = _tpu_params()
        self._single_buffer_ok = None   # learned on first call

        # ---- logical (un-padded) f32 parameters, PyTorch-style init ----------
        self.hidden = []  # list of (W, b), W stored as (in, out) -> y = x @ W + b
        for i, dim_mlp in enumerate(dim_mlp_list):
            in_ch = dim_in if i == 0 else dim_mlp_list[i - 1]
            key, kw, kb = jax.random.split(key, 3)
            bound = 1.0 / float(in_ch) ** 0.5
            W = jax.random.uniform(kw, (in_ch, dim_mlp), jnp.float32, -bound, bound)
            b = jax.random.uniform(kb, (1, dim_mlp), jnp.float32, -bound, bound)
            self.hidden.append((W, b))

        head_in = dim_mlp_list[-1] if len(dim_mlp_list) > 0 else dim_in
        if use_norm:
            key, kw = jax.random.split(key)
            # NormedLinear init: uniform(-1,1); forward normalizes columns anyway.
            self.head_W = jax.random.uniform(kw, (head_in, dim_out), jnp.float32, -1.0, 1.0)
            self.head_b = None
        else:
            key, kw, kb = jax.random.split(key, 3)
            bound = 1.0 / float(head_in) ** 0.5
            self.head_W = jax.random.uniform(kw, (head_in, dim_out), jnp.float32, -bound, bound)
            self.head_b = jax.random.uniform(kb, (1, dim_out), jnp.float32, -bound, bound)

        # ---- lane-dense (multiple-of-128) padded copies, built once ----------
        self.dims_logical = [dim_in] + list(dim_mlp_list) + [dim_out]
        self.dims_p = [_round_up(d, LANE) for d in self.dims_logical]

        def pad2(a, rows_p, cols_p):
            return jnp.zeros((rows_p, cols_p), a.dtype).at[:a.shape[0], :a.shape[1]].set(a)

        self._weight_args = []
        for i, (W, b) in enumerate(self.hidden):
            Wp = pad2(W.astype(weight_dtype), self.dims_p[i], self.dims_p[i + 1])
            bp = pad2(b, 1, self.dims_p[i + 1])              # bias stays f32
            self._weight_args += [Wp, bp]

        hw = self.head_W
        if use_norm:
            # Hoist static weight-column normalization out of the kernel (f32 math).
            hw = hw * jax.lax.rsqrt(
                jnp.maximum(jnp.sum(hw * hw, axis=0, keepdims=True), 1e-24))
        self._weight_args.append(pad2(hw.astype(weight_dtype),
                                      self.dims_p[-2], self.dims_p[-1]))
        if not use_norm:
            self._weight_args.append(pad2(self.head_b, 1, self.dims_p[-1]))

        self.num_hidden = len(self.hidden)
        self._kernel = _build_fused_mlp_kernel(self.num_hidden, use_norm, weight_dtype)

    # --- rough fused-kernel VMEM footprint (bytes) --- #
    def _vmem_footprint(self, tile_m):
        wbytes = sum(int(a.size) * int(a.dtype.itemsize) for a in self._weight_args)
        max_d = max(self.dims_p)
        act_bytes = 3 * tile_m * max_d * 4                               # live f32 temps
        io_bytes = 2 * tile_m * (self.dims_p[0] + self.dims_p[-1]) * 4   # 2x-buffered x/out
        return wbytes + act_bytes + io_bytes

    def _run(self, xp, B, Bp, tile_m, vmem_limit, single_buffer_weights):
        d_in_p, d_out_p = self.dims_p[0], self.dims_p[-1]
        wkw = {"pipeline_mode": pl.Buffered(1)} if single_buffer_weights else {}

        in_specs = [pl.BlockSpec((tile_m, d_in_p), lambda i: (i, 0))]
        for a in self._weight_args:
            # Constant index_map: weights stay VMEM-resident; single-buffer when allowed.
            in_specs.append(pl.BlockSpec(a.shape, lambda i: (0, 0), **wkw))

        # Cost estimate with LOGICAL (unpadded) dims — scheduler hint only.
        dims = self.dims_logical
        w_isz = int(self._weight_args[0].dtype.itemsize) if self._weight_args else 4
        flops = sum(2 * B * dims[k] * dims[k + 1] for k in range(len(dims) - 1))
        bytes_accessed = (4 * B * (dims[0] + dims[-1])
                          + sum(dims[k] * dims[k + 1] * w_isz + 4 * dims[k + 1]
                                for k in range(len(dims) - 1)))

        return pl.pallas_call(
            self._kernel,
            out_shape=jax.ShapeDtypeStruct((Bp, d_out_p), xp.dtype),
            grid_spec=pltpu.PrefetchScalarGridSpec(
                num_scalar_prefetch=0,
                grid=(Bp // tile_m,),
                in_specs=in_specs,
                out_specs=pl.BlockSpec((tile_m, d_out_p), lambda i: (i, 0)),
            ),
            compiler_params=pltpu.CompilerParams(
                dimension_semantics=("parallel",),
                vmem_limit_bytes=vmem_limit,
            ),
            cost_estimate=pl.CostEstimate(
                flops=flops,
                transcendentals=B if self.use_norm else 0,
                bytes_accessed=bytes_accessed,
            ),
        )(xp, *self._weight_args)

    # --- fused Pallas forward --- #
    def __call__(self, x, tile_m=None):
        B = x.shape[0]
        quantum, two_cores, vmem_limit = self._hw

        if tile_m is None:
            wbytes = sum(int(a.size) * int(a.dtype.itemsize) for a in self._weight_args)
            requested = 1024 if wbytes < (4 << 20) else 512
        else:
            requested = int(tile_m)
        tm = _pick_tile_m(B, requested, quantum, two_cores)

        # VMEM-footprint guard: shrink the batch tile until the fused kernel fits.
        budget = int(0.85 * vmem_limit)
        while tm > SUBLANE and self._vmem_footprint(tm) > budget:
            tm = max(_round_up(tm // 2, SUBLANE), SUBLANE)
        # TODO(synk): if the resident weight stack alone exceeds the VMEM budget (huge
        # MLPs on v7x's 64 MiB), split into multiple pallas_calls over layer groups.

        Bp = _round_up(_round_up(B, SUBLANE), tm)
        d_in_p = self.dims_p[0]
        xp = jnp.zeros((Bp, d_in_p), x.dtype).at[:B, :x.shape[1]].set(x)

        if self._single_buffer_ok is not False:
            try:
                out = jax.block_until_ready(
                    self._run(xp, B, Bp, tm, vmem_limit, single_buffer_weights=True))
                self._single_buffer_ok = True
                return out[:B, :self.dim_out]
            except Exception:
                # pipeline_mode=pl.Buffered(1) not supported by this JAX/Mosaic build.
                self._single_buffer_ok = False
        out = self._run(xp, B, Bp, tm, vmem_limit, single_buffer_weights=False)
        return out[:B, :self.dim_out]

    # --- pure-jnp f32 reference (mirrors the PyTorch module) for verification --- #
    def reference(self, x):
        for W, b in self.hidden:
            y = x @ W + b
            x = jnp.where(y >= 0, y, NEG_SLOPE * y)
        if self.use_norm:
            xn = x / jnp.maximum(jnp.linalg.norm(x, axis=1, keepdims=True), 1e-12)
            wn = self.head_W / jnp.maximum(
                jnp.linalg.norm(self.head_W, axis=0, keepdims=True), 1e-12)
            return xn @ wn
        return x @ self.head_W + self.head_b


# --------------------------------- main -------------------------------------- #

if __name__ == "__main__":
    key = jax.random.PRNGKey(0)
    kx, kp1, kp2, kp3, kp4 = jax.random.split(key, 5)

    batch, dim_in, dim_mlp_list, dim_out = 8, 32, [64, 48], 16
    x = jax.random.normal(kx, (batch, dim_in), jnp.float32)

    # bf16-weight fast path, plain Linear head
    mlp = MLPPallas(dim_in, dim_mlp_list, dim_out, use_norm=False, key=kp1)
    out = jax.block_until_ready(mlp(x))
    ref = mlp.reference(x)
    assert out.shape == (batch, dim_out)
    assert jnp.allclose(out, ref, atol=5e-2, rtol=5e-2), "linear-head (bf16) mismatch"

    # bf16-weight fast path, NormedLinear head
    mlp_n = MLPPallas(dim_in, dim_mlp_list, dim_out, use_norm=True, key=kp2)
    out_n = jax.block_until_ready(mlp_n(x))
    ref_n = mlp_n.reference(x)
    assert out_n.shape == (batch, dim_out)
    assert jnp.allclose(out_n, ref_n, atol=5e-2, rtol=5e-2), "normed-head (bf16) mismatch"

    # exact-f32 mode: strict numerical parity with the reference
    mlp_f = MLPPallas(dim_in, dim_mlp_list, dim_out, use_norm=False,
                      weight_dtype=jnp.float32, key=kp3)
    out_f = jax.block_until_ready(mlp_f(x))
    assert jnp.allclose(out_f, mlp_f.reference(x), atol=1e-5, rtol=1e-5), "f32 mismatch"

    # head-only edge case + awkward batch size exercising multiple grid steps
    xb = jax.random.normal(kx, (300, dim_in), jnp.float32)
    mlp_0 = MLPPallas(dim_in, [], dim_out, use_norm=False, key=kp4)
    out_0 = jax.block_until_ready(mlp_0(xb, tile_m=256))
    assert out_0.shape == (300, dim_out)
    assert jnp.allclose(out_0, mlp_0.reference(xb), atol=5e-2, rtol=5e-2), "head-only mismatch"

    print("KERNEL_OK")
</pallas_src>

<mosaic_0001>
module attributes {stable_mosaic.version = 11 : i64} {
  func.func @kernel(%arg0: i32, %arg1: memref<8x128xf32, #tpu.memory_space<vmem>>, %arg2: memref<128x128xbf16, #tpu.memory_space<vmem>>, %arg3: memref<1x128xf32, #tpu.memory_space<vmem>>, %arg4: memref<128x128xbf16, #tpu.memory_space<vmem>>, %arg5: memref<1x128xf32, #tpu.memory_space<vmem>>, %arg6: memref<128x128xbf16, #tpu.memory_space<vmem>>, %arg7: memref<1x128xf32, #tpu.memory_space<vmem>>, %arg8: memref<8x128xf32, #tpu.memory_space<vmem>>) attributes {dimension_semantics = [#tpu.dimension_semantics<parallel>], iteration_bounds = array<i64: 1>, scalar_prefetch = 0 : i64, scratch_operands = 0 : i64, tpu.core_type = #tpu.core_type<tc>, window_params = [{transform_indices = @transform_0, window_bounds = array<i64: 8, 128>}, {pipeline_mode = #tpu.pipeline_mode<synchronous>, transform_indices = @transform_1, window_bounds = array<i64: 128, 128>}, {pipeline_mode = #tpu.pipeline_mode<synchronous>, transform_indices = @transform_2, window_bounds = array<i64: 1, 128>}, {pipeline_mode = #tpu.pipeline_mode<synchronous>, transform_indices = @transform_3, window_bounds = array<i64: 128, 128>}, {pipeline_mode = #tpu.pipeline_mode<synchronous>, transform_indices = @transform_4, window_bounds = array<i64: 1, 128>}, {pipeline_mode = #tpu.pipeline_mode<synchronous>, transform_indices = @transform_5, window_bounds = array<i64: 128, 128>}, {pipeline_mode = #tpu.pipeline_mode<synchronous>, transform_indices = @transform_6, window_bounds = array<i64: 1, 128>}, {transform_indices = @transform_7, window_bounds = array<i64: 8, 128>}]} {
    %c0 = arith.constant 0 : index
    %c0_0 = arith.constant 0 : index
    %0 = vector.load %arg1[%c0, %c0_0] : memref<8x128xf32, #tpu.memory_space<vmem>>, vector<8x128xf32>
    %c0_1 = arith.constant 0 : index
    %c0_2 = arith.constant 0 : index
    %1 = vector.load %arg2[%c0_1, %c0_2] : memref<128x128xbf16, #tpu.memory_space<vmem>>, vector<128x128xbf16>
    %c0_3 = arith.constant 0 : index
    %c0_4 = arith.constant 0 : index
    %2 = vector.load %arg3[%c0_3, %c0_4] : memref<1x128xf32, #tpu.memory_space<vmem>>, vector<1x128xf32>
    %3 = arith.truncf %0 : vector<8x128xf32> to vector<8x128xbf16>
    %cst = arith.constant dense<0.000000e+00> : vector<8x128xf32>
    %4 = tpu.matmul %3, %1, %cst {dimension_numbers = #tpu.dot_dimension_numbers<[1], [0], [0], [1], [0, 0, 1, 1], [], []>} : vector<8x128xbf16>, vector<128x128xbf16>, vector<8x128xf32> -> vector<8x128xf32>
    %5 = vector.broadcast %2 : vector<1x128xf32> to vector<8x128xf32>
    %6 = arith.addf %4, %5 : vector<8x128xf32>
    %cst_5 = arith.constant 0.00999999977 : f32
    %7 = vector.broadcast %cst_5 : f32 to vector<8x128xf32>
    %8 = arith.mulf %7, %6 : vector<8x128xf32>
    %9 = arith.maximumf %6, %8 : vector<8x128xf32>
    %c0_6 = arith.constant 0 : index
    %c0_7 = arith.constant 0 : index
    %10 = vector.load %arg4[%c0_6, %c0_7] : memref<128x128xbf16, #tpu.memory_space<vmem>>, vector<128x128xbf16>
    %c0_8 = arith.constant 0 : index
    %c0_9 = arith.constant 0 : index
    %11 = vector.load %arg5[%c0_8, %c0_9] : memref<1x128xf32, #tpu.memory_space<vmem>>, vector<1x128xf32>
    %12 = arith.truncf %9 : vector<8x128xf32> to vector<8x128xbf16>
    %cst_10 = arith.constant dense<0.000000e+00> : vector<8x128xf32>
    %13 = tpu.matmul %12, %10, %cst_10 {dimension_numbers = #tpu.dot_dimension_numbers<[1], [0], [0], [1], [0, 0, 1, 1], [], []>} : vector<8x128xbf16>, vector<128x128xbf16>, vector<8x128xf32> -> vector<8x128xf32>
    %14 = vector.broadcast %11 : vector<1x128xf32> to vector<8x128xf32>
    %15 = arith.addf %13, %14 : vector<8x128xf32>
    %cst_11 = arith.constant 0.00999999977 : f32
    %16 = vector.broadcast %cst_11 : f32 to vector<8x128xf32>
    %17 = arith.mulf %16, %15 : vector<8x128xf32>
    %18 = arith.maximumf %15, %17 : vector<8x128xf32>
    %c0_12 = arith.constant 0 : index
    %c0_13 = arith.constant 0 : index
    %19 = vector.load %arg6[%c0_12, %c0_13] : memref<128x128xbf16, #tpu.memory_space<vmem>>, vector<128x128xbf16>
    %c0_14 = arith.constant 0 : index
    %c0_15 = arith.constant 0 : index
    %20 = vector.load %arg7[%c0_14, %c0_15] : memref<1x128xf32, #tpu.memory_space<vmem>>, vector<1x128xf32>
    %21 = arith.truncf %18 : vector<8x128xf32> to vector<8x128xbf16>
    %cst_16 = arith.constant dense<0.000000e+00> : vector<8x128xf32>
    %22 = tpu.matmul %21, %19, %cst_16 {dimension_numbers = #tpu.dot_dimension_numbers<[1], [0], [0], [1], [0, 0, 1, 1], [], []>} : vector<8x128xbf16>, vector<128x128xbf16>, vector<8x128xf32> -> vector<8x128xf32>
    %23 = vector.broadcast %20 : vector<1x128xf32> to vector<8x128xf32>
    %24 = arith.addf %22, %23 : vector<8x128xf32>
    %c0_17 = arith.constant 0 : index
    %c0_18 = arith.constant 0 : index
    %25 = vector.load %arg8[%c0_17, %c0_18] : memref<8x128xf32, #tpu.memory_space<vmem>>, vector<8x128xf32>
    tpu.vector_store %arg8[%c0_17, %c0_18], %24 {strides = array<i32>} : memref<8x128xf32, #tpu.memory_space<vmem>>, vector<8x128xf32>,
    return
  }
  func.func @transform_0(%arg0: i32) -> (i32, i32) {
    %c0_i32 = arith.constant 0 : i32
    %c0_i32_0 = arith.constant 0 : i32
    return %arg0, %c0_i32 : i32, i32
  }
  func.func @transform_1(%arg0: i32) -> (i32, i32) {
    %c0_i32 = arith.constant 0 : i32
    %c0_i32_0 = arith.constant 0 : i32
    %c0_i32_1 = arith.constant 0 : i32
    return %c0_i32, %c0_i32_0 : i32, i32
  }
  func.func @transform_2(%arg0: i32) -> (i32, i32) {
    %c0_i32 = arith.constant 0 : i32
    %c0_i32_0 = arith.constant 0 : i32
    %c0_i32_1 = arith.constant 0 : i32
    return %c0_i32, %c0_i32_0 : i32, i32
  }
  func.func @transform_3(%arg0: i32) -> (i32, i32) {
    %c0_i32 = arith.constant 0 : i32
    %c0_i32_0 = arith.constant 0 : i32
    %c0_i32_1 = arith.constant 0 : i32
    return %c0_i32, %c0_i32_0 : i32, i32
  }
  func.func @transform_4(%arg0: i32) -> (i32, i32) {
    %c0_i32 = arith.constant 0 : i32
    %c0_i32_0 = arith.constant 0 : i32
    %c0_i32_1 = arith.constant 0 : i32
    return %c0_i32, %c0_i32_0 : i32, i32
  }
  func.func @transform_5(%arg0: i32) -> (i32, i32) {
    %c0_i32 = arith.constant 0 : i32
    %c0_i32_0 = arith.constant 0 : i32
    %c0_i32_1 = arith.constant 0 : i32
    return %c0_i32, %c0_i32_0 : i32, i32
  }
  func.func @transform_6(%arg0: i32) -> (i32, i32) {
    %c0_i32 = arith.constant 0 : i32
    %c0_i32_0 = arith.constant 0 : i32
    %c0_i32_1 = arith.constant 0 : i32
    return %c0_i32, %c0_i32_0 : i32, i32
  }
  func.func @transform_7(%arg0: i32) -> (i32, i32) {
    %c0_i32 = arith.constant 0 : i32
    %c0_i32_0 = arith.constant 0 : i32
    return %arg0, %c0_i32 : i32, i32
  }
}

module attributes {stable_mosaic.version = 11 : i64} {
  func.func @kernel(%arg0: i32, %arg1: memref<8x128xf32, #tpu.memory_space<vmem>>, %arg2: memref<128x128xbf16, #tpu.memory_space<vmem>>, %arg3: memref<1x128xf32, #tpu.memory_space<vmem>>, %arg4: memref<128x128xbf16, #tpu.memory_space<vmem>>, %arg5: memref<1x128xf32, #tpu.memory_space<vmem>>, %arg6: memref<128x128xbf16, #tpu.memory_space<vmem>>, %arg7: memref<1x128xf32, #tpu.memory_space<vmem>>, %arg8: memref<8x128xf32, #tpu.memory_space<vmem>>) attributes {dimension_semantics = [#tpu.dimension_semantics<parallel>], iteration_bounds = array<i64: 1>, scalar_prefetch = 0 : i64, scratch_operands = 0 : i64, tpu.core_type = #tpu.core_type<tc>, window_params = [{transform_indices = @transform_0, window_bounds = array<i64: 8, 128>}, {pipeline_mode = #tpu.pipeline_mode<synchronous>, transform_indices = @transform_1, window_bounds = array<i64: 128, 128>}, {pipeline_mode = #tpu.pipeline_mode<synchronous>, transform_indices = @transform_2, window_bounds = array<i64: 1, 128>}, {pipeline_mode = #tpu.pipeline_mode<synchronous>, transform_indices = @transform_3, window_bounds = array<i64: 128, 128>}, {pipeline_mode = #tpu.pipeline_mode<synchronous>, transform_indices = @transform_4, window_bounds = array<i64: 1, 128>}, {pipeline_mode = #tpu.pipeline_mode<synchronous>, transform_indices = @transform_5, window_bounds = array<i64: 128, 128>}, {pipeline_mode = #tpu.pipeline_mode<synchronous>, transform_indices = @transform_6, window_bounds = array<i64: 1, 128>}, {transform_indices = @transform_7, window_bounds = array<i64: 8, 128>}]} {
    %c0 = arith.constant 0 : index
    %c0_0 = arith.constant 0 : index
    %0 = vector.load %arg1[%c0, %c0_0] : memref<8x128xf32, #tpu.memory_space<vmem>>, vector<8x128xf32>
    %c0_1 = arith.constant 0 : index
    %c0_2 = arith.constant 0 : index
    %1 = vector.load %arg2[%c0_1, %c0_2] : memref<128x128xbf16, #tpu.memory_space<vmem>>, vector<128x128xbf16>
    %c0_3 = arith.constant 0 : index
    %c0_4 = arith.constant 0 : index
    %2 = vector.load %arg3[%c0_3, %c0_4] : memref<1x128xf32, #tpu.memory_space<vmem>>, vector<1x128xf32>
    %3 = arith.truncf %0 : vector<8x128xf32> to vector<8x128xbf16>
    %cst = arith.constant dense<0.000000e+00> : vector<8x128xf32>
    %4 = tpu.matmul %3, %1, %cst {dimension_numbers = #tpu.dot_dimension_numbers<[1], [0], [0], [1], [0, 0, 1, 1], [], []>} : vector<8x128xbf16>, vector<128x128xbf16>, vector<8x128xf32> -> vector<8x128xf32>
    %5 = vector.broadcast %2 : vector<1x128xf32> to vector<8x128xf32>
    %6 = arith.addf %4, %5 : vector<8x128xf32>
    %cst_5 = arith.constant 0.00999999977 : f32
    %7 = vector.broadcast %cst_5 : f32 to vector<8x128xf32>
    %8 = arith.mulf %7, %6 : vector<8x128xf32>
    %9 = arith.maximumf %6, %8 : vector<8x128xf32>
    %c0_6 = arith.constant 0 : index
    %c0_7 = arith.constant 0 : index
    %10 = vector.load %arg4[%c0_6, %c0_7] : memref<128x128xbf16, #tpu.memory_space<vmem>>, vector<128x128xbf16>
    %c0_8 = arith.constant 0 : index
    %c0_9 = arith.constant 0 : index
    %11 = vector.load %arg5[%c0_8, %c0_9] : memref<1x128xf32, #tpu.memory_space<vmem>>, vector<1x128xf32>
    %12 = arith.truncf %9 : vector<8x128xf32> to vector<8x128xbf16>
    %cst_10 = arith.constant dense<0.000000e+00> : vector<8x128xf32>
    %13 = tpu.matmul %12, %10, %cst_10 {dimension_numbers = #tpu.dot_dimension_numbers<[1], [0], [0], [1], [0, 0, 1, 1], [], []>} : vector<8x128xbf16>, vector<128x128xbf16>, vector<8x128xf32> -> vector<8x128xf32>
    %14 = vector.broadcast %11 : vector<1x128xf32> to vector<8x128xf32>
    %15 = arith.addf %13, %14 : vector<8x128xf32>
    %cst_11 = arith.constant 0.00999999977 : f32
    %16 = vector.broadcast %cst_11 : f32 to vector<8x128xf32>
    %17 = arith.mulf %16, %15 : vector<8x128xf32>
    %18 = arith.maximumf %15, %17 : vector<8x128xf32>
    %c0_12 = arith.constant 0 : index
    %c0_13 = arith.constant 0 : index
    %19 = vector.load %arg6[%c0_12, %c0_13] : memref<128x128xbf16, #tpu.memory_space<vmem>>, vector<128x128xbf16>
    %c0_14 = arith.constant 0 : index
    %c0_15 = arith.constant 0 : index
    %20 = vector.load %arg7[%c0_14, %c0_15] : memref<1x128xf32, #tpu.memory_space<vmem>>, vector<1x128xf32>
    %21 = arith.truncf %18 : vector<8x128xf32> to vector<8x128xbf16>
    %cst_16 = arith.constant dense<0.000000e+00> : vector<8x128xf32>
    %22 = tpu.matmul %21, %19, %cst_16 {dimension_numbers = #tpu.dot_dimension_numbers<[1], [0], [0], [1], [0, 0, 1, 1], [], []>} : vector<8x128xbf16>, vector<128x128xbf16>, vector<8x128xf32> -> vector<8x128xf32>
    %23 = vector.broadcast %20 : vector<1x128xf32> to vector<8x128xf32>
    %24 = arith.addf %22, %23 : vector<8x128xf32>
    %c0_17 = arith.constant 0 : index
    %c0_18 = arith.constant 0 : index
    %25 = vector.load %arg8[%c0_17, %c0_18] : memref<8x128xf32, #tpu.memory_space<vmem>>, vector<8x128xf32>
    tpu.vector_store %arg8[%c0_17, %c0_18], %24 {strides = array<i32>} : memref<8x128xf32, #tpu.memory_space<vmem>>, vector<8x128xf32>,
    return
  }
  func.func @transform_0(%arg0: i32) -> (i32, i32) {
    %c0_i32 = arith.constant 0 : i32
    %c0_i32_0 = arith.constant 0 : i32
    return %arg0, %c0_i32 : i32, i32
  }
  func.func @transform_1(%arg0: i32) -> (i32, i32) {
    %c0_i32 = arith.constant 0 : i32
    %c0_i32_0 = arith.constant 0 : i32
    %c0_i32_1 = arith.constant 0 : i32
    return %c0_i32, %c0_i32_0 : i32, i32
  }
  func.func @transform_2(%arg0: i32) -> (i32, i32) {
    %c0_i32 = arith.constant 0 : i32
    %c0_i32_0 = arith.constant 0 : i32
    %c0_i32_1 = arith.constant 0 : i32
    return %c0_i32, %c0_i32_0 : i32, i32
  }
  func.func @transform_3(%arg0: i32) -> (i32, i32) {
    %c0_i32 = arith.constant 0 : i32
    %c0_i32_0 = arith.constant 0 : i32
    %c0_i32_1 = arith.constant 0 : i32
    return %c0_i32, %c0_i32_0 : i32, i32
  }
  func.func @transform_4(%arg0: i32) -> (i32, i32) {
    %c0_i32 = arith.constant 0 : i32
    %c0_i32_0 = arith.constant 0 : i32
    %c0_i32_1 = arith.constant 0 : i32
    return %c0_i32, %c0_i32_0 : i32, i32
  }
  func.func @transform_5(%arg0: i32) -> (i32, i32) {
    %c0_i32 = arith.constant 0 : i32
    %c0_i32_0 = arith.constant 0 : i32
    %c0_i32_1 = arith.constant 0 : i32
    return %c0_i32, %c0_i32_0 : i32, i32
  }
  func.func @transform_6(%arg0: i32) -> (i32, i32) {
    %c0_i32 = arith.constant 0 : i32
    %c0_i32_0 = arith.constant 0 : i32
    %c0_i32_1 = arith.constant 0 : i32
    return %c0_i32, %c0_i32_0 : i32, i32
  }
  func.func @transform_7(%arg0: i32) -> (i32, i32) {
    %c0_i32 = arith.constant 0 : i32
    %c0_i32_0 = arith.constant 0 : i32
    return %arg0, %c0_i32 : i32, i32
  }
}

</mosaic_0001>

<bundles_post_ra>
// kernel: tpu_custom_call.1
= control target key start
LH: loop header
LB: loop body
LE: loop exit
PB: predicated region body
PF: predicated region fallthrough
CT: control target
= control target key end

     0   :  { %12 = vsyncpa [#allocation3], 0  ;;  %s688_s0 = inlined_call_operand.hbm [shape: f32[8,128], index: 0, kind: input, shape index: {}]   ;;  %s689_s1 = inlined_call_operand.hbm [shape: bf16[128,128], index: 1, kind: input, shape index: {}]   ;;  %s690_s2 = inlined_call_operand.vmem [shape: f32[1,128], index: 2, kind: input, shape index: {}]   ;;  %s691_s3 = inlined_call_operand.hbm [shape: bf16[128,128], index: 3, kind: input, shape index: {}]   ;;  %s692_s4 = inlined_call_operand.vmem [shape: f32[1,128], index: 4, kind: input, shape index: {}]   ;;  %s693_s5 = inlined_call_operand.hbm [shape: bf16[128,128], index: 5, kind: input, shape index: {}]   ;;  %s694_s6 = inlined_call_operand.vmem [shape: f32[1,128], index: 6, kind: input, shape index: {}]   ;;  %s695_s7 = inlined_call_operand.hbm [shape: f32[8,128], index: 7, kind: output, shape index: {}]  }
   0x1   :  { %13 = vsyncpa [#allocation6], 0 }
   0x2   :  { %14 = vsyncpa [#allocation9], 0  ;;  %s31_s26 = sshll.u32 %s689_s1, 4  ;;  %s32_s26 = int_to_ptr.hbm [resolvable:$true] %s31_s26 }
   0x3   :  { %15 = vsyncpa [#allocation4], 0  ;;  %s617_s27 = smov [#allocation5]   ;;  %s21_s8 = sshll.u32 %s688_s0, 4  ;;  %s22_s8 = int_to_ptr.hbm [resolvable:$true] %s21_s8 }
   0x4   :  { %s33_s28 = sshll.u32 %s617_s27, 4  ;;  %s618_s9 = smov 64   ;;  %s34_s28 = int_to_ptr.vmem [resolvable:$true] %s33_s28 }
   0x5   :  { %s619_s10 = smov 4   ;;  %s620_s11 = smov [#allocation2]  }
   0x6   :  { %39 = dma.hbm_to_vmem [thread:$0]  %s32_s26, 1024, %s34_s28, [#allocation6], %s618_s9, %s618_s9, %s619_s10  }
   0x7   :  { %s23_s12 = sshll.u32 %s620_s11, 4  ;;  %s46_s15 = sshll.u32 %s691_s3, 4  ;;  %s24_s12 = int_to_ptr.vmem [resolvable:$true] %s23_s12  ;;  %s47_s15 = int_to_ptr.hbm [resolvable:$true] %s46_s15 }
   0x8   :  { %26 = dma.hbm_to_vmem [thread:$0]  %s22_s8, 128, %s24_s12, [#allocation3]  }
   0x9   :  { %s61_s17 = sshll.u32 %s693_s5, 4  ;;  %s621_s18 = smov [#allocation7]   ;;  %s62_s17 = int_to_ptr.hbm [resolvable:$true] %s61_s17 }
   0xa   :  { %s48_s19 = sshll.u32 %s621_s18, 4  ;;  %s622_s0 = smov [#allocation8]   ;;  %s49_s19 = int_to_ptr.vmem [resolvable:$true] %s48_s19 }
   0xb   :  { %54 = dma.hbm_to_vmem [thread:$0]  %s47_s15, 1024, %s49_s19, [#allocation6], %s618_s9, %s618_s9, %s619_s10  }
   0xc   :  { %s63_s20 = sshll.u32 %s622_s0, 4  ;;  %s64_s20 = int_to_ptr.vmem [resolvable:$true] %s63_s20 }
   0xd   :  { %69 = dma.hbm_to_vmem [thread:$0]  %s62_s17, 1024, %s64_s20, [#allocation9], %s618_s9, %s618_s9, %s619_s10  }
   0xe   :  { %609 = dma.done.wait [#allocation3], 128  }
   0xf   :  { %610 = vsyncadd [#allocation3], 4294967168 }
  0x10   :  { %611 = dma.done.wait [#allocation6], 2048  }
  0x11   :  { %612 = vsyncadd [#allocation6], 4294965248 }
  0x12   :  { %613 = dma.done.wait [#allocation9], 1024  }
  0x13   :  { %614 = vsyncadd [#allocation9], 4294966272  ;;  %v462_v0 = vld [vmem:[#allocation5 + $0x38] sm:$0xff]  ;;  %v461_v1 = vld [vmem:[#allocation5 + $0x30] sm:$0xff]  ;;  %s623_s24 = smov [#allocation10]   ;;  %s347_s28 = sshll.u32 %s695_s7, 4  ;;  %s348_s28 = int_to_ptr.hbm [resolvable:$true] %s347_s28 }
  0x14   :  { %158 = vmatpush.bf16.msra.mxu0 %v462_v0  ;;  %v470_v2 = vld [vmem:[#allocation7 + $0x38] sm:$0xff]  ;;  %v469_v3 = vld [vmem:[#allocation7 + $0x30] sm:$0xff]  ;;  %v460_v4 = vld [vmem:[#allocation5 + $0x28] sm:$0xff]  ;;  %s345_s25 = sshll.u32 %s623_s24, 4  ;;  %s346_s25 = int_to_ptr.vmem [resolvable:$true] %s345_s25 }
  0x15   :  { %242 = vmatpush.bf16.msra.mxu1 %v470_v2  ;;  %v468_v5 = vld [vmem:[#allocation7 + $0x28] sm:$0xff]  ;;  %v459_v6 = vld [vmem:[#allocation5 + $0x20] sm:$0xff]  ;;  %v458_v8 = vld [vmem:[#allocation5 + $0x18] sm:$0xff] }
  0x16   :  { %v467_v7 = vld [vmem:[#allocation7 + $0x20] sm:$0xff]  ;;  %v466_v9 = vld [vmem:[#allocation7 + $0x18] sm:$0xff]  ;;  %v457_v10 = vld [vmem:[#allocation5 + $0x10] sm:$0xff] }
  0x17   :  { %v465_v11 = vld [vmem:[#allocation7 + $0x10] sm:$0xff]  ;;  %v456_v12 = vld [vmem:[#allocation5 + $0x8] sm:$0xff]  ;;  %v455_v13 = vld [vmem:[#allocation5] sm:$0xff] }
  0x18   :  { %159 = vmatpush.bf16.msra.mxu0 %v461_v1  ;;  %v88_v14 = vld [vmem:[#allocation2] sm:$0xff]  ;;  %v464_v16 = vld [vmem:[#allocation7 + $0x8] sm:$0xff]  ;;  %v463_v17 = vld [vmem:[#allocation7] sm:$0xff] }
  0x19   :  { %243 = vmatpush.bf16.msra.mxu1 %v469_v3  ;;  %v106_v15 = vpack.c.bf16 %v88_v14, %v88_v14  ;;  %v478_v18 = vld [vmem:[#allocation8 + $0x38] sm:$0xff]  ;;  %v477_v19 = vld [vmem:[#allocation8 + $0x30] sm:$0xff]  ;;  %v476_v20 = vld [vmem:[#allocation8 + $0x28] sm:$0xff] }
  0x1a   :  { %326 = vmatpush.bf16.msra.mxu2 %v478_v18  ;;  %v475_v21 = vld [vmem:[#allocation8 + $0x20] sm:$0xff]  ;;  %v474_v22 = vld [vmem:[#allocation8 + $0x18] sm:$0xff]  ;;  %v473_v23 = vld [vmem:[#allocation8 + $0x10] sm:$0xff] }
  0x1b   :  { %v486_v24 = vld [vmem:[%s690_s2] ss:$0 sm:$0xff]  ;;  %v472_v31 = vld [vmem:[#allocation8 + $0x8] sm:$0xff]  ;;  %v471_v32 = vld [vmem:[#allocation8] sm:$0xff] }
  0x1c   :  { %160 = vmatpush.bf16.msra.mxu0 %v460_v4  ;;  %v487_v33 = vld [vmem:[%s692_s4] ss:$0 sm:$0xff] }
  0x1d   :  { %244 = vmatpush.bf16.msra.mxu1 %v468_v5  ;;  %v488_v40 = vld [vmem:[%s694_s6] ss:$0 sm:$0xff] }
  0x1e   :  { %327 = vmatpush.bf16.msra.mxu2 %v477_v19 }
  0x20   :  { %161 = vmatpush.bf16.msra.mxu0 %v459_v6 }
  0x21   :  { %245 = vmatpush.bf16.msra.mxu1 %v467_v7 }
  0x22   :  { %328 = vmatpush.bf16.msra.mxu2 %v476_v20 }
  0x24   :  { %162 = vmatpush.bf16.msra.mxu0 %v458_v8 }
  0x25   :  { %246 = vmatpush.bf16.msra.mxu1 %v466_v9 }
  0x26   :  { %329 = vmatpush.bf16.msra.mxu2 %v475_v21 }
  0x28   :  { %163 = vmatpush.bf16.msra.mxu0 %v457_v10 }
  0x29   :  { %247 = vmatpush.bf16.msra.mxu1 %v465_v11 }
  0x2a   :  { %330 = vmatpush.bf16.msra.mxu2 %v474_v22 }
  0x2c   :  { %164 = vmatpush.bf16.msra.mxu0 %v456_v12 }
  0x2d   :  { %248 = vmatpush.bf16.msra.mxu1 %v464_v16 }
  0x2e   :  { %331 = vmatpush.bf16.msra.mxu2 %v473_v23 }
  0x30   :  { %165 = vmatpush.bf16.msra.mxu0 %v455_v13 }
  0x31   :  { %249 = vmatpush.bf16.msra.mxu1 %v463_v17 }
  0x32   :  { %332 = vmatpush.bf16.msra.mxu2 %v472_v31 }
  0x33   :  { %166 = vmatmul.bf16.vlgmr.msra.gmra.mxu0 %v106_v15 }
  0x36   :  { %333 = vmatpush.bf16.msra.mxu2 %v471_v32 }
  0xb0   :  { %v167_v25 = vpop.f32.mrf.mxu0 }
  0xb1   :  { %v168_v26 = vadd.f32 %v486_v24, %v167_v25 }
  0xb3   :  { %v171_v27 = vmul.f32 0.01, %v168_v26 }
  0xb5   :  { %v172_v28 = vmax.f32 %v168_v26, %v171_v27 }
  0xb7   :  { %v190_v29 = vpack.c.bf16 %v172_v28, %v172_v28 }
  0xb8   :  { %v169_v30 = vpop.f32.mrf.mxu0 }
  0xb9   :  { %250 = vmatmul.bf16.vlgmr.msra.gmra.mxu1 %v190_v29 }
 0x136   :  { %v251_v34 = vpop.f32.mrf.mxu1 }
 0x137   :  { %v252_v35 = vadd.f32 %v487_v33, %v251_v34 }
 0x139   :  { %v255_v36 = vmul.f32 0.01, %v252_v35 }
 0x13b   :  { %v256_v37 = vmax.f32 %v252_v35, %v255_v36 }
 0x13d   :  { %v274_v38 = vpack.c.bf16 %v256_v37, %v256_v37 }
 0x13e   :  { %v253_v39 = vpop.f32.mrf.mxu1 }
 0x13f   :  { %334 = vmatmul.bf16.vlgmr.msra.gmra.mxu2 %v274_v38 }
 0x1c2   :  { %v335_v41 = vpop.f32.mrf.mxu2 }
 0x1c3   :  { %v336_v42 = vadd.f32 %v488_v40, %v335_v41 }
 0x1c5   :  { %339 = vst [vmem:[#allocation10] sm:$0xff] %v336_v42 }
 0x1c6   :  { %350 = dma.vmem_to_hbm [thread:$0]  %s346_s25, 128, %s348_s28, [#allocation4]  }
 0x1ca   :  { %v337_v43 = vpop.f32.mrf.mxu2 }
 0x1cb   :  { %615 = dma.done.wait [#allocation4], 128  }
 0x1cc   :  { %616 = vsyncadd [#allocation4], 4294967168 }
 0x1cd   :  { %355 = vsyncpa [#allocation3], 1 }
 0x1ce   :  { %356 = vsyncpa [#allocation6], 1 }
 0x1cf   :  { %357 = vsyncpa [#allocation9], 1 }
 0x1d0   :  { %358 = vsyncpa [#allocation4], 1 }

// kernel: tpu_custom_call.1
= control target key start
LH: loop header
LB: loop body
LE: loop exit
PB: predicated region body
PF: predicated region fallthrough
CT: control target
= control target key end

     0   :  { %12 = vsyncpa [#allocation3], 0  ;;  %s688_s0 = inlined_call_operand.hbm [shape: f32[8,128], index: 0, kind: input, shape index: {}]   ;;  %s689_s1 = inlined_call_operand.hbm [shape: bf16[128,128], index: 1, kind: input, shape index: {}]   ;;  %s690_s2 = inlined_call_operand.vmem [shape: f32[1,128], index: 2, kind: input, shape index: {}]   ;;  %s691_s3 = inlined_call_operand.hbm [shape: bf16[128,128], index: 3, kind: input, shape index: {}]   ;;  %s692_s4 = inlined_call_operand.vmem [shape: f32[1,128], index: 4, kind: input, shape index: {}]   ;;  %s693_s5 = inlined_call_operand.hbm [shape: bf16[128,128], index: 5, kind: input, shape index: {}]   ;;  %s694_s6 = inlined_call_operand.vmem [shape: f32[1,128], index: 6, kind: input, shape index: {}]   ;;  %s695_s7 = inlined_call_operand.hbm [shape: f32[8,128], index: 7, kind: output, shape index: {}]  }
   0x1   :  { %13 = vsyncpa [#allocation6], 0 }
   0x2   :  { %14 = vsyncpa [#allocation9], 0  ;;  %s31_s26 = sshll.u32 %s689_s1, 4  ;;  %s32_s26 = int_to_ptr.hbm [resolvable:$true] %s31_s26 }
   0x3   :  { %15 = vsyncpa [#allocation4], 0  ;;  %s617_s27 = smov [#allocation5]   ;;  %s21_s8 = sshll.u32 %s688_s0, 4  ;;  %s22_s8 = int_to_ptr.hbm [resolvable:$true] %s21_s8 }
   0x4   :  { %s33_s28 = sshll.u32 %s617_s27, 4  ;;  %s618_s9 = smov 64   ;;  %s34_s28 = int_to_ptr.vmem [resolvable:$true] %s33_s28 }
   0x5   :  { %s619_s10 = smov 4   ;;  %s620_s11 = smov [#allocation2]  }
   0x6   :  { %39 = dma.hbm_to_vmem [thread:$0]  %s32_s26, 1024, %s34_s28, [#allocation6], %s618_s9, %s618_s9, %s619_s10  }
   0x7   :  { %s23_s12 = sshll.u32 %s620_s11, 4  ;;  %s46_s15 = sshll.u32 %s691_s3, 4  ;;  %s24_s12 = int_to_ptr.vmem [resolvable:$true] %s23_s12  ;;  %s47_s15 = int_to_ptr.hbm [resolvable:$true] %s46_s15 }
   0x8   :  { %26 = dma.hbm_to_vmem [thread:$0]  %s22_s8, 128, %s24_s12, [#allocation3]  }
   0x9   :  { %s61_s17 = sshll.u32 %s693_s5, 4  ;;  %s621_s18 = smov [#allocation7]   ;;  %s62_s17 = int_to_ptr.hbm [resolvable:$true] %s61_s17 }
   0xa   :  { %s48_s19 = sshll.u32 %s621_s18, 4  ;;  %s622_s0 = smov [#allocation8]   ;;  %s49_s19 = int_to_ptr.vmem [resolvable:$true] %s48_s19 }
   0xb   :  { %54 = dma.hbm_to_vmem [thread:$0]  %s47_s15, 1024, %s49_s19, [#allocation6], %s618_s9, %s618_s9, %s619_s10  }
   0xc   :  { %s63_s20 = sshll.u32 %s622_s0, 4  ;;  %s64_s20 = int_to_ptr.vmem [resolvable:$true] %s63_s20 }
   0xd   :  { %69 = dma.hbm_to_vmem [thread:$0]  %s62_s17, 1024, %s64_s20, [#allocation9], %s618_s9, %s618_s9, %s619_s10  }
   0xe   :  { %609 = dma.done.wait [#allocation3], 128  }
   0xf   :  { %610 = vsyncadd [#allocation3], 4294967168 }
  0x10   :  { %611 = dma.done.wait [#allocation6], 2048  }
  0x11   :  { %612 = vsyncadd [#allocation6], 4294965248 }
  0x12   :  { %613 = dma.done.wait [#allocation9], 1024  }
  0x13   :  { %614 = vsyncadd [#allocation9], 4294966272  ;;  %v462_v0 = vld [vmem:[#allocation5 + $0x38] sm:$0xff]  ;;  %v461_v1 = vld [vmem:[#allocation5 + $0x30] sm:$0xff]  ;;  %s623_s24 = smov [#allocation10]   ;;  %s347_s28 = sshll.u32 %s695_s7, 4  ;;  %s348_s28 = int_to_ptr.hbm [resolvable:$true] %s347_s28 }
  0x14   :  { %158 = vmatpush.bf16.msra.mxu0 %v462_v0  ;;  %v470_v2 = vld [vmem:[#allocation7 + $0x38] sm:$0xff]  ;;  %v469_v3 = vld [vmem:[#allocation7 + $0x30] sm:$0xff]  ;;  %v460_v4 = vld [vmem:[#allocation5 + $0x28] sm:$0xff]  ;;  %s345_s25 = sshll.u32 %s623_s24, 4  ;;  %s346_s25 = int_to_ptr.vmem [resolvable:$true] %s345_s25 }
  0x15   :  { %242 = vmatpush.bf16.msra.mxu1 %v470_v2  ;;  %v468_v5 = vld [vmem:[#allocation7 + $0x28] sm:$0xff]  ;;  %v459_v6 = vld [vmem:[#allocation5 + $0x20] sm:$0xff]  ;;  %v458_v8 = vld [vmem:[#allocation5 + $0x18] sm:$0xff] }
  0x16   :  { %v467_v7 = vld [vmem:[#allocation7 + $0x20] sm:$0xff]  ;;  %v466_v9 = vld [vmem:[#allocation7 + $0x18] sm:$0xff]  ;;  %v457_v10 = vld [vmem:[#allocation5 + $0x10] sm:$0xff] }
  0x17   :  { %v465_v11 = vld [vmem:[#allocation7 + $0x10] sm:$0xff]  ;;  %v456_v12 = vld [vmem:[#allocation5 + $0x8] sm:$0xff]  ;;  %v455_v13 = vld [vmem:[#allocation5] sm:$0xff] }
  0x18   :  { %159 = vmatpush.bf16.msra.mxu0 %v461_v1  ;;  %v88_v14 = vld [vmem:[#allocation2] sm:$0xff]  ;;  %v464_v16 = vld [vmem:[#allocation7 + $0x8] sm:$0xff]  ;;  %v463_v17 = vld [vmem:[#allocation7] sm:$0xff] }
  0x19   :  { %243 = vmatpush.bf16.msra.mxu1 %v469_v3  ;;  %v106_v15 = vpack.c.bf16 %v88_v14, %v88_v14  ;;  %v478_v18 = vld [vmem:[#allocation8 + $0x38] sm:$0xff]  ;;  %v477_v19 = vld [vmem:[#allocation8 + $0x30] sm:$0xff]  ;;  %v476_v20 = vld [vmem:[#allocation8 + $0x28] sm:$0xff] }
  0x1a   :  { %326 = vmatpush.bf16.msra.mxu2 %v478_v18  ;;  %v475_v21 = vld [vmem:[#allocation8 + $0x20] sm:$0xff]  ;;  %v474_v22 = vld [vmem:[#allocation8 + $0x18] sm:$0xff]  ;;  %v473_v23 = vld [vmem:[#allocation8 + $0x10] sm:$0xff] }
  0x1b   :  { %v486_v24 = vld [vmem:[%s690_s2] ss:$0 sm:$0xff]  ;;  %v472_v31 = vld [vmem:[#allocation8 + $0x8] sm:$0xff]  ;;  %v471_v32 = vld [vmem:[#allocation8] sm:$0xff] }
  0x1c   :  { %160 = vmatpush.bf16.msra.mxu0 %v460_v4  ;;  %v487_v33 = vld [vmem:[%s692_s4] ss:$0 sm:$0xff] }
  0x1d   :  { %244 = vmatpush.bf16.msra.mxu1 %v468_v5  ;;  %v488_v40 = vld [vmem:[%s694_s6] ss:$0 sm:$0xff] }
  0x1e   :  { %327 = vmatpush.bf16.msra.mxu2 %v477_v19 }
  0x20   :  { %161 = vmatpush.bf16.msra.mxu0 %v459_v6 }
  0x21   :  { %245 = vmatpush.bf16.msra.mxu1 %v467_v7 }
  0x22   :  { %328 = vmatpush.bf16.msra.mxu2 %v476_v20 }
  0x24   :  { %162 = vmatpush.bf16.msra.mxu0 %v458_v8 }
  0x25   :  { %246 = vmatpush.bf16.msra.mxu1 %v466_v9 }
  0x26   :  { %329 = vmatpush.bf16.msra.mxu2 %v475_v21 }
  0x28   :  { %163 = vmatpush.bf16.msra.mxu0 %v457_v10 }
  0x29   :  { %247 = vmatpush.bf16.msra.mxu1 %v465_v11 }
  0x2a   :  { %330 = vmatpush.bf16.msra.mxu2 %v474_v22 }
  0x2c   :  { %164 = vmatpush.bf16.msra.mxu0 %v456_v12 }
  0x2d   :  { %248 = vmatpush.bf16.msra.mxu1 %v464_v16 }
  0x2e   :  { %331 = vmatpush.bf16.msra.mxu2 %v473_v23 }
  0x30   :  { %165 = vmatpush.bf16.msra.mxu0 %v455_v13 }
  0x31   :  { %249 = vmatpush.bf16.msra.mxu1 %v463_v17 }
  0x32   :  { %332 = vmatpush.bf16.msra.mxu2 %v472_v31 }
  0x33   :  { %166 = vmatmul.bf16.vlgmr.msra.gmra.mxu0 %v106_v15 }
  0x36   :  { %333 = vmatpush.bf16.msra.mxu2 %v471_v32 }
  0xb0   :  { %v167_v25 = vpop.f32.mrf.mxu0 }
  0xb1   :  { %v168_v26 = vadd.f32 %v486_v24, %v167_v25 }
  0xb3   :  { %v171_v27 = vmul.f32 0.01, %v168_v26 }
  0xb5   :  { %v172_v28 = vmax.f32 %v168_v26, %v171_v27 }
  0xb7   :  { %v190_v29 = vpack.c.bf16 %v172_v28, %v172_v28 }
  0xb8   :  { %v169_v30 = vpop.f32.mrf.mxu0 }
  0xb9   :  { %250 = vmatmul.bf16.vlgmr.msra.gmra.mxu1 %v190_v29 }
 0x136   :  { %v251_v34 = vpop.f32.mrf.mxu1 }
 0x137   :  { %v252_v35 = vadd.f32 %v487_v33, %v251_v34 }
 0x139   :  { %v255_v36 = vmul.f32 0.01, %v252_v35 }
 0x13b   :  { %v256_v37 = vmax.f32 %v252_v35, %v255_v36 }
 0x13d   :  { %v274_v38 = vpack.c.bf16 %v256_v37, %v256_v37 }
 0x13e   :  { %v253_v39 = vpop.f32.mrf.mxu1 }
 0x13f   :  { %334 = vmatmul.bf16.vlgmr.msra.gmra.mxu2 %v274_v38 }
 0x1c2   :  { %v335_v41 = vpop.f32.mrf.mxu2 }
 0x1c3   :  { %v336_v42 = vadd.f32 %v488_v40, %v335_v41 }
 0x1c5   :  { %339 = vst [vmem:[#allocation10] sm:$0xff] %v336_v42 }
 0x1c6   :  { %350 = dma.vmem_to_hbm [thread:$0]  %s346_s25, 128, %s348_s28, [#allocation4]  }
 0x1ca   :  { %v337_v43 = vpop.f32.mrf.mxu2 }
 0x1cb   :  { %615 = dma.done.wait [#allocation4], 128  }
 0x1cc   :  { %616 = vsyncadd [#allocation4], 4294967168 }
 0x1cd   :  { %355 = vsyncpa [#allocation3], 1 }
 0x1ce   :  { %356 = vsyncpa [#allocation6], 1 }
 0x1cf   :  { %357 = vsyncpa [#allocation9], 1 }
 0x1d0   :  { %358 = vsyncpa [#allocation4], 1 }

</bundles_post_ra>
